<compile_context>
chip_gen: v5e
topology: v5e:2x2
jax: 0.10.0
libtpu: 0.0.40
codegen_flags: <defaults>
</compile_context>

<pallas_src>
import jax
import jax.numpy as jnp
from jax.experimental import pallas as pl
from jax.experimental.pallas import tpu as pltpu


def _round_up(a, b):
    return (a + b - 1) // b * b


def _cdiv(a, b):
    return (a + b - 1) // b


# ---------------------------------------------------------------------------
# Pallas kernel: one tile of TILE_N nodes, nodes on the 128-lane axis.
#   x_ref     [DP, TN]  rows = [pos_x, pos_y, pos_z, onehot_0..Z-1, 1.0]
#   w1t_ref   [H, DP]   = [W1^T | b1]     (resident; b1 folded via the ones row)
#   w2row_ref [1, H]                       (resident)
#   w2col_ref [H, 1]                       (resident)
#   nw1p_ref  [3, H]    = -W1[:3, :]       (resident; pre-negated on host)
#   e0b2_ref  [1, DP]   = [0, 0, 0, E0_0..E0_{Z-1}, b2]   (resident)
#   out_ref   [4, TN]   row 0 = node_energy, rows 1..3 = forces
# ---------------------------------------------------------------------------
def lammps_bam_kernel(x_ref, w1t_ref, w2row_ref, w2col_ref, nw1p_ref, e0b2_ref,
                      out_ref):
    x = x_ref[...]                                                       # [DP, TN]

    # hidden layer (b1 folded): MXU matmul, lane-dense in N, tanh on EUP
    h = jnp.tanh(
        jnp.dot(w1t_ref[...], x, preferred_element_type=jnp.float32))    # [H, TN]

    # per-node energy: w2.h + (E0[species] + b2), both as MXU matmuls
    node_e = jnp.dot(w2row_ref[...], h, preferred_element_type=jnp.float32)
    node_e = node_e + jnp.dot(e0b2_ref[...], x,
                              preferred_element_type=jnp.float32)        # [1, TN]

    # forces = -dE/dpos = (-W1[:3,:]) @ (w2 * (1 - h^2))
    g = (1.0 - h * h) * w2col_ref[...]                                   # [H, TN]
    forces = jnp.dot(nw1p_ref[...], g, preferred_element_type=jnp.float32)  # [3, TN]

    out_ref[0:1, :] = node_e
    out_ref[1:4, :] = forces


# ---------------------------------------------------------------------------
# Wrapper (parameter packing, padding, per-graph reduction, slicing)
# ---------------------------------------------------------------------------
def lammps_bam_forward(params, data, local_or_ghost, tile_n=8192):
    """Mirrors LAMMPS_BAM.forward.

    params: dict with W1 [D,H], b1 [H], w2 [H], b2 (scalar), E0 [Z]
    data:   dict with 'positions' [N,3], 'node_onehot' [N,Z],
            'batch' [N] int32, 'ptr' [G+1] int32
    local_or_ghost: [N] float32 mask
    """
    positions = data["positions"]
    onehot = data["node_onehot"]
    batch = data["batch"]
    ptr = data["ptr"]

    n = positions.shape[0]
    z = onehot.shape[1]
    num_graphs = ptr.shape[0] - 1

    # --- pack weights (host-side, tiny, all VMEM-resident in the kernel) ---
    w1 = params["W1"].astype(jnp.float32)                                  # [D, H]
    d, h_dim = w1.shape
    dp = d + 1                                                             # +1 ones row
    b1 = params["b1"].astype(jnp.float32)
    w2 = params["w2"].astype(jnp.float32)
    e0 = params["E0"].astype(jnp.float32)
    b2 = params["b2"].astype(jnp.float32)

    w1t_aug = jnp.concatenate([jnp.transpose(w1), b1[:, None]], axis=1)    # [H, DP]
    w2row = w2[None, :]                                                    # [1, H]
    w2col = w2[:, None]                                                    # [H, 1]
    neg_w1pos = -w1[:3, :]                                                 # [3, H]
    e0b2row = jnp.concatenate(
        [jnp.zeros((3,), jnp.float32), e0, b2[None]])[None, :]             # [1, DP]

    # --- tile-size selection ------------------------------------------------
    # Shrink the tile for small N (aim for >=2 grid steps: v7x megacore),
    # floor at 128 lanes.  Padding overhead stays < one tile.
    if n <= tile_n:
        tile_n = max(128, _round_up(_cdiv(n, 2), 128))
    n_pad = _round_up(n, tile_n)
    grid = (n_pad // tile_n,)

    # --- pack node stream, N on the lane axis, padded to TILE_N --------------
    # TODO(synk): if upstream can provide node data already as a lane-dense
    # [DP, N] slab (and consume forces as [3, N]), these concat/transpose/pad
    # passes (which rival the kernel's own HBM traffic) disappear entirely.
    ones_row = jnp.ones((n, 1), jnp.float32)
    x = jnp.concatenate(
        [positions.astype(jnp.float32), onehot.astype(jnp.float32), ones_row],
        axis=-1)                                                           # [N, DP]
    x_t = jnp.pad(jnp.transpose(x), ((0, 0), (0, n_pad - n)))              # [DP, N_pad]

    node_spec = lambda rows: pl.BlockSpec((rows, tile_n), lambda i: (0, i))
    const_spec = lambda shp: pl.BlockSpec(shp, lambda i: (0, 0))

    out_t = pl.pallas_call(
        lammps_bam_kernel,
        grid=grid,
        in_specs=[
            node_spec(dp),                   # x (streamed, double-buffered)
            const_spec((h_dim, dp)),         # [W1^T | b1]     (resident)
            const_spec((1, h_dim)),          # w2 row          (resident)
            const_spec((h_dim, 1)),          # w2 col          (resident)
            const_spec((3, h_dim)),          # -W1[:3,:]       (resident)
            const_spec((1, dp)),             # [0,0,0,E0..,b2] (resident)
        ],
        out_specs=node_spec(4),              # fused [node_e; forces] block
        out_shape=jax.ShapeDtypeStruct((4, n_pad), jnp.float32),
        compiler_params=pltpu.CompilerParams(
            dimension_semantics=("parallel",),
            vmem_limit_bytes=32 * 1024 * 1024,
        ),
    )(x_t, w1t_aug, w2row, w2col, neg_w1pos, e0b2row)

    # Tail lanes [n:n_pad] hold garbage forces -> always slice before use.
    node_energy = out_t[0, :n]                                             # [N]
    forces = jnp.transpose(out_t[1:4, :n])                                 # [N, 3]

    # node_energy_local = node_energy * local_or_ghost
    # total_energy_local = scatter_sum(node_energy_local, index=batch)
    ne_local = node_energy * local_or_ghost.astype(jnp.float32)
    total_energy_local = jax.ops.segment_sum(ne_local, batch,
                                             num_segments=num_graphs)

    return {
        "total_energy_local": total_energy_local,             # [G]
        "node_energy": node_energy,                           # [N]
        "forces": forces,                                     # [N, 3]
        "virials": jnp.zeros((1, 3, 3), dtype=jnp.float32),   # [1, 3, 3]
    }


# ---------------------------------------------------------------------------
# Pure-JAX reference (autodiff forces, like torch.autograd.grad)
# ---------------------------------------------------------------------------
def _ref_node_energy(positions, onehot, params):
    x = jnp.concatenate([positions, onehot], axis=-1)
    h = jnp.tanh(x @ params["W1"] + params["b1"])
    e0 = onehot @ params["E0"]
    return h @ params["w2"] + params["b2"] + e0


def lammps_bam_reference(params, data, local_or_ghost):
    positions = data["positions"]
    onehot = data["node_onehot"]
    batch = data["batch"]
    num_graphs = data["ptr"].shape[0] - 1

    node_energy = _ref_node_energy(positions, onehot, params)
    forces = -jax.grad(
        lambda p: jnp.sum(_ref_node_energy(p, onehot, params)))(positions)
    ne_local = node_energy * local_or_ghost
    total = jax.ops.segment_sum(ne_local, batch, num_segments=num_graphs)
    return {
        "total_energy_local": total,
        "node_energy": node_energy,
        "forces": forces,
        "virials": jnp.zeros((1, 3, 3), dtype=jnp.float32),
    }


if __name__ == "__main__":
    key = jax.random.PRNGKey(0)
    kpos, kw1, kb1, kw2, kb2, ke0, ksp, kmask = jax.random.split(key, 8)

    # small synthetic system: N=8 atoms, Z=4 species, H=32 hidden, G=2 graphs
    N, Z, H, G = 8, 4, 32, 2
    D = 3 + Z

    positions = jax.random.normal(kpos, (N, 3), dtype=jnp.float32) * 2.0
    species = jax.random.randint(ksp, (N,), 0, Z)
    node_onehot = jax.nn.one_hot(species, Z, dtype=jnp.float32)
    batch = jnp.array([0, 0, 0, 0, 1, 1, 1, 1], dtype=jnp.int32)
    ptr = jnp.array([0, 4, 8], dtype=jnp.int32)
    local_or_ghost = (jax.random.uniform(kmask, (N,)) > 0.3).astype(jnp.float32)

    params = {
        "W1": jax.random.normal(kw1, (D, H), dtype=jnp.float32) * 0.3,
        "b1": jax.random.normal(kb1, (H,), dtype=jnp.float32) * 0.1,
        "w2": jax.random.normal(kw2, (H,), dtype=jnp.float32) * 0.3,
        "b2": jax.random.normal(kb2, (), dtype=jnp.float32) * 0.1,
        "E0": jax.random.normal(ke0, (Z,), dtype=jnp.float32),
    }

    # buffers from the PyTorch module (registered for fidelity; the synthetic
    # model does not consume them on the hot path)
    atomic_numbers = jnp.array([1, 6, 8, 14], dtype=jnp.int32)
    r_max = jnp.array(5.0, dtype=jnp.float32)
    num_interactions = jnp.array(2, dtype=jnp.int32)
    head = jnp.array([0], dtype=jnp.int32)
    # TODO(synk): message-passing interactions (edge gather/scatter within r_max)
    # of the real MACE model are not reproduced by this synthetic per-node model.

    data = {
        "positions": positions,
        "node_onehot": node_onehot,
        "batch": batch,
        "ptr": ptr,
        "head": head,
    }

    out = lammps_bam_forward(params, data, local_or_ghost)
    jax.block_until_ready(out)

    ref = lammps_bam_reference(params, data, local_or_ghost)
    for k_ in ("total_energy_local", "node_energy", "forces", "virials"):
        assert jnp.allclose(out[k_], ref[k_], atol=1e-4, rtol=1e-4), k_

    print("KERNEL_OK")
</pallas_src>

<mosaic_0001>
module attributes {stable_mosaic.version = 11 : i64} {
  func.func @lammps_bam_kernel(%arg0: i32, %arg1: memref<8x128xf32, #tpu.memory_space<vmem>>, %arg2: memref<32x8xf32, #tpu.memory_space<vmem>>, %arg3: memref<1x32xf32, #tpu.memory_space<vmem>>, %arg4: memref<32x1xf32, #tpu.memory_space<vmem>>, %arg5: memref<3x32xf32, #tpu.memory_space<vmem>>, %arg6: memref<1x8xf32, #tpu.memory_space<vmem>>, %arg7: memref<4x128xf32, #tpu.memory_space<vmem>>) attributes {dimension_semantics = [#tpu.dimension_semantics<parallel>], iteration_bounds = array<i64: 1>, scalar_prefetch = 0 : i64, scratch_operands = 0 : i64, tpu.core_type = #tpu.core_type<tc>, window_params = [{transform_indices = @transform_0, window_bounds = array<i64: 8, 128>}, {pipeline_mode = #tpu.pipeline_mode<synchronous>, transform_indices = @transform_1, window_bounds = array<i64: 32, 8>}, {pipeline_mode = #tpu.pipeline_mode<synchronous>, transform_indices = @transform_2, window_bounds = array<i64: 1, 32>}, {pipeline_mode = #tpu.pipeline_mode<synchronous>, transform_indices = @transform_3, window_bounds = array<i64: 32, 1>}, {pipeline_mode = #tpu.pipeline_mode<synchronous>, transform_indices = @transform_4, window_bounds = array<i64: 3, 32>}, {pipeline_mode = #tpu.pipeline_mode<synchronous>, transform_indices = @transform_5, window_bounds = array<i64: 1, 8>}, {transform_indices = @transform_6, window_bounds = array<i64: 4, 128>}]} {
    %c0 = arith.constant 0 : index
    %c0_0 = arith.constant 0 : index
    %0 = vector.load %arg1[%c0, %c0_0] : memref<8x128xf32, #tpu.memory_space<vmem>>, vector<8x128xf32>
    %c0_1 = arith.constant 0 : index
    %c0_2 = arith.constant 0 : index
    %1 = vector.load %arg2[%c0_1, %c0_2] : memref<32x8xf32, #tpu.memory_space<vmem>>, vector<32x8xf32>
    %cst = arith.constant dense<0.000000e+00> : vector<32x128xf32>
    %2 = tpu.matmul %1, %0, %cst {dimension_numbers = #tpu.dot_dimension_numbers<[1], [0], [0], [1], [0, 0, 1, 1], [], []>} : vector<32x8xf32>, vector<8x128xf32>, vector<32x128xf32> -> vector<32x128xf32>
    %3 = math.tanh %2 : vector<32x128xf32>
    %c0_3 = arith.constant 0 : index
    %c0_4 = arith.constant 0 : index
    %4 = vector.load %arg3[%c0_3, %c0_4] : memref<1x32xf32, #tpu.memory_space<vmem>>, vector<1x32xf32>
    %cst_5 = arith.constant dense<0.000000e+00> : vector<1x128xf32>
    %5 = tpu.matmul %4, %3, %cst_5 {dimension_numbers = #tpu.dot_dimension_numbers<[1], [0], [0], [1], [0, 0, 1, 1], [], []>} : vector<1x32xf32>, vector<32x128xf32>, vector<1x128xf32> -> vector<1x128xf32>
    %c0_6 = arith.constant 0 : index
    %c0_7 = arith.constant 0 : index
    %6 = vector.load %arg6[%c0_6, %c0_7] : memref<1x8xf32, #tpu.memory_space<vmem>>, vector<1x8xf32>
    %cst_8 = arith.constant dense<0.000000e+00> : vector<1x128xf32>
    %7 = tpu.matmul %6, %0, %cst_8 {dimension_numbers = #tpu.dot_dimension_numbers<[1], [0], [0], [1], [0, 0, 1, 1], [], []>} : vector<1x8xf32>, vector<8x128xf32>, vector<1x128xf32> -> vector<1x128xf32>
    %8 = arith.addf %5, %7 : vector<1x128xf32>
    %9 = arith.mulf %3, %3 : vector<32x128xf32>
    %cst_9 = arith.constant 1.000000e+00 : f32
    %10 = vector.broadcast %cst_9 : f32 to vector<32x128xf32>
    %11 = arith.subf %10, %9 : vector<32x128xf32>
    %c0_10 = arith.constant 0 : index
    %c0_11 = arith.constant 0 : index
    %12 = vector.load %arg4[%c0_10, %c0_11] : memref<32x1xf32, #tpu.memory_space<vmem>>, vector<32x1xf32>
    %13 = vector.broadcast %12 : vector<32x1xf32> to vector<32x128xf32>
    %14 = arith.mulf %11, %13 : vector<32x128xf32>
    %c0_12 = arith.constant 0 : index
    %c0_13 = arith.constant 0 : index
    %15 = vector.load %arg5[%c0_12, %c0_13] : memref<3x32xf32, #tpu.memory_space<vmem>>, vector<3x32xf32>
    %cst_14 = arith.constant dense<0.000000e+00> : vector<3x128xf32>
    %16 = tpu.matmul %15, %14, %cst_14 {dimension_numbers = #tpu.dot_dimension_numbers<[1], [0], [0], [1], [0, 0, 1, 1], [], []>} : vector<3x32xf32>, vector<32x128xf32>, vector<3x128xf32> -> vector<3x128xf32>
    %c0_15 = arith.constant 0 : index
    %c0_16 = arith.constant 0 : index
    %17 = vector.load %arg7[%c0_15, %c0_16] : memref<4x128xf32, #tpu.memory_space<vmem>>, vector<1x128xf32>
    tpu.vector_store %arg7[%c0_15, %c0_16], %8 {strides = array<i32>} : memref<4x128xf32, #tpu.memory_space<vmem>>, vector<1x128xf32>,
    %c1 = arith.constant 1 : index
    %c0_17 = arith.constant 0 : index
    %18 = vector.load %arg7[%c1, %c0_17] : memref<4x128xf32, #tpu.memory_space<vmem>>, vector<3x128xf32>
    tpu.vector_store %arg7[%c1, %c0_17], %16 {strides = array<i32>} : memref<4x128xf32, #tpu.memory_space<vmem>>, vector<3x128xf32>,
    return
  }
  func.func @transform_0(%arg0: i32) -> (i32, i32) {
    %c0_i32 = arith.constant 0 : i32
    %c0_i32_0 = arith.constant 0 : i32
    return %c0_i32, %arg0 : i32, i32
  }
  func.func @transform_1(%arg0: i32) -> (i32, i32) {
    %c0_i32 = arith.constant 0 : i32
    %c0_i32_0 = arith.constant 0 : i32
    %c0_i32_1 = arith.constant 0 : i32
    return %c0_i32, %c0_i32_0 : i32, i32
  }
  func.func @transform_2(%arg0: i32) -> (i32, i32) {
    %c0_i32 = arith.constant 0 : i32
    %c0_i32_0 = arith.constant 0 : i32
    %c0_i32_1 = arith.constant 0 : i32
    return %c0_i32, %c0_i32_0 : i32, i32
  }
  func.func @transform_3(%arg0: i32) -> (i32, i32) {
    %c0_i32 = arith.constant 0 : i32
    %c0_i32_0 = arith.constant 0 : i32
    %c0_i32_1 = arith.constant 0 : i32
    return %c0_i32, %c0_i32_0 : i32, i32
  }
  func.func @transform_4(%arg0: i32) -> (i32, i32) {
    %c0_i32 = arith.constant 0 : i32
    %c0_i32_0 = arith.constant 0 : i32
    %c0_i32_1 = arith.constant 0 : i32
    return %c0_i32, %c0_i32_0 : i32, i32
  }
  func.func @transform_5(%arg0: i32) -> (i32, i32) {
    %c0_i32 = arith.constant 0 : i32
    %c0_i32_0 = arith.constant 0 : i32
    %c0_i32_1 = arith.constant 0 : i32
    return %c0_i32, %c0_i32_0 : i32, i32
  }
  func.func @transform_6(%arg0: i32) -> (i32, i32) {
    %c0_i32 = arith.constant 0 : i32
    %c0_i32_0 = arith.constant 0 : i32
    return %c0_i32, %arg0 : i32, i32
  }
}

</mosaic_0001>

<bundles_post_ra>
// kernel: tpu_custom_call.1
= control target key start
LH: loop header
LB: loop body
LE: loop exit
PB: predicated region body
PF: predicated region fallthrough
CT: control target
= control target key end

     0   :  { %vm29_vm0 = vcmask 64512   ;;  %s330_s0 = inlined_call_operand.vmem [shape: f32[8,128], index: 0, kind: input, shape index: {}]   ;;  %s331_s1 = inlined_call_operand.vmem [shape: f32[32,8], index: 1, kind: input, shape index: {}]   ;;  %s332_s2 = inlined_call_operand.vmem [shape: f32[1,32], index: 2, kind: input, shape index: {}]   ;;  %s333_s3 = inlined_call_operand.vmem [shape: f32[32,1], index: 3, kind: input, shape index: {}]   ;;  %s334_s4 = inlined_call_operand.vmem [shape: f32[3,32], index: 4, kind: input, shape index: {}]   ;;  %s335_s5 = inlined_call_operand.vmem [shape: f32[1,8], index: 5, kind: input, shape index: {}]   ;;  %s336_s6 = inlined_call_operand.hbm [shape: f32[4,128], index: 6, kind: output, shape index: {}]  }
   0x1   :  { %v24_v0 = vld [vmem:[%s330_s0] sm:$0xff]  ;;  %v27_v2 = vld [vmem:[%s331_s1 + $0x10] sm:$0xff]  ;;  %v28_v3 = vld [vmem:[%s331_s1 + $0x18] sm:$0xff] }
   0x2   :  { %v25_v1 = vld [vmem:[%s331_s1] sm:$0xff]  ;;  %57 = vmatpush.msra.mxu0 %v24_v0  ;;  %209 = vmatpush.msra.mxu1 %v24_v0  ;;  %v135_v4 = vld [vmem:[%s333_s3 + $0x18] sm:$0xff]  ;;  %v133_v5 = vld [vmem:[%s333_s3 + $0x8] sm:$0xff] }
   0x3   :  { %210 = vmatpush.msra.mxu2 %v24_v0  ;;  %202 = vmatmul.msk.f32.vlgmr.msra.gmra.mxu0 %vm29_vm0, %v25_v1 }
   0x4   :  { %204 = vmatmul.msk.f32.vlgmr.msra.gmra.mxu1 %vm29_vm0, %v27_v2  ;;  %205 = vmatmul.msk.f32.vlgmr.msra.gmra.mxu2 %vm29_vm0, %v28_v3 }
   0x5   :  { %11 = vsyncpa [#allocation3], 0  ;;  %v249_v6 = vmov 0   ;;  %95 = vmatpush.msrb.mxu1 %v24_v0  ;;  %v26_v7 = vld [vmem:[%s331_s1 + $0x8] sm:$0xff]  ;;  %v134_v8 = vld [vmem:[%s333_s3 + $0x10] sm:$0xff]  ;;  %vm100_vm1 = vcmask 261120  }
   0x6   :  { %213 = vset.pattern.permute.xlu0 %v249_v6  ;;  %214 = vset.pattern.permute.xlu1 %v249_v6  ;;  %v132_v9 = vld [vmem:[%s333_s3] sm:$0xff]  ;;  %s193_s20 = sshll.u32 %s336_s6, 4  ;;  %s194_s20 = int_to_ptr.hbm [resolvable:$true] %s193_s20 }
   0x7   :  { %153 = vperm.xlu0 %213, %v135_v4   ;;  %143 = vperm.xlu1 %214, %v133_v5   ;;  %v76_v10 = vld [vmem:[%s335_s5] sm:$0x1] }
   0x8   :  { %v75_v30 = vld [vmem:[%s332_s2] sm:$0x1]  ;;  %s250_s2 = smov [#allocation2]  }
   0x9   :  { %v160_v36 = vld [vmem:[%s334_s4] sm:$0x7]  ;;  %s191_s17 = sshll.u32 %s250_s2, 4  ;;  %s192_s17 = int_to_ptr.vmem [resolvable:$true] %s191_s17 }
   0xb   :  { %203 = vmatmul.msk.f32.gmra.mxu0 %vm29_vm0, %v26_v7 }
   0xc   :  { %206 = vmatmul.msk.f32.vlgmr.msrb.gmra.mxu1 %vm29_vm0, %v76_v10 }
   0xf   :  { %148 = vperm.xlu0 %213, %v134_v8   ;;  %138 = vperm.xlu1 %214, %v132_v9  }
  0x79   :  { %v154_v14 = vpop.permute.xlu0 %153  ;;  %v144_v17 = vpop.permute.xlu1 %143 }
  0x80   :  { %v59_v11 = vpop.f32.mrf.mxu0 }
  0x81   :  { %v65_v12 = vpop.f32.mrf.mxu1  ;;  %v149_v27 = vpop.permute.xlu0 %148 }
  0x82   :  { %215 = vtanh.f32 %v65_v12  ;;  %v139_v33 = vpop.permute.xlu1 %138 }
  0x83   :  { %217 = vtanh.f32 %v59_v11 }
  0x87   :  { %v68_v13 = vpop.f32.mrf.mxu2 }
  0x88   :  { %219 = vtanh.f32 %v68_v13  ;;  %v62_v15 = vpop.f32.mrf.mxu0  ;;  %v216_v16 = vpop.eup %215 }
  0x89   :  { %221 = vtanh.f32 %v62_v15  ;;  %v218_v18 = vpop.eup %217  ;;  %v126_v19 = vmul.f32 %v216_v16, %v216_v16  ;;  %v97_v37 = vpop.f32.mrf.mxu1 }
  0x8a   :  { %v124_v25 = vmul.f32 %v218_v18, %v218_v18 }
  0x8b   :  { %v130_v24 = vsub.f32 1.0, %v126_v19 }
  0x8c   :  { %v128_v32 = vsub.f32 1.0, %v124_v25 }
  0x8d   :  { %v158_v31 = vmul.f32 %v149_v27, %v130_v24 }
  0x8e   :  { %v220_v20 = vpop.eup %219  ;;  %v156_v35 = vmul.f32 %v139_v33, %v128_v32 }
  0x8f   :  { %v222_v21 = vpop.eup %221  ;;  %116 = vmatpush.msrb.mxu2 %v220_v20  ;;  %v127_v22 = vmul.f32 %v220_v20, %v220_v20 }
  0x90   :  { %v125_v23 = vmul.f32 %v222_v21, %v222_v21 }
  0x91   :  { %117 = vmatpush.msrb.mxu2 %v216_v16  ;;  %v131_v26 = vsub.f32 1.0, %v127_v22 }
  0x92   :  { %v129_v29 = vsub.f32 1.0, %v125_v23 }
  0x93   :  { %118 = vmatpush.msrb.mxu2 %v222_v21  ;;  %v159_v28 = vmul.f32 %v154_v14, %v131_v26 }
  0x94   :  { %v157_v34 = vmul.f32 %v144_v17, %v129_v29 }
  0x95   :  { %119 = vmatpush.msrb.mxu2 %v218_v18  ;;  %176 = vmatpush.msra.mxu3 %v159_v28 }
  0x96   :  { %207 = vmatmul.msk.f32.vlgmr.msrb.gmra.mxu2 %vm100_vm1, %v75_v30 }
  0x97   :  { %177 = vmatpush.msra.mxu3 %v158_v31 }
  0x99   :  { %178 = vmatpush.msra.mxu3 %v157_v34 }
  0x9b   :  { %179 = vmatpush.msra.mxu3 %v156_v35 }
  0x9c   :  { %208 = vmatmul.msk.f32.vlgmr.msra.gmra.mxu3 %vm100_vm1, %v160_v36 }
 0x119   :  { %v121_v38 = vpop.f32.mrf.mxu2 }
 0x11a   :  { %v122_v39 = vadd.f32 %v121_v38, %v97_v37 }
 0x11c   :  { %184 = vst [vmem:[#allocation2] sm:$0x1] %v122_v39 }
 0x11f   :  { %v181_v40 = vpop.f32.mrf.mxu3 }
 0x120   :  { %185 = vst [vmem:[#allocation2 + $0x1] sm:$0x7] %v181_v40 }
 0x121   :  { %196 = dma.vmem_to_hbm [thread:$0]  %s192_s17, 64, %s194_s20, [#allocation3]  }
 0x122   :  { %247 = dma.done.wait [#allocation3], 64  }
 0x123   :  { %248 = vsyncadd [#allocation3], 4294967232 }
 0x124   :  { %201 = vsyncpa [#allocation3], 1 }

</bundles_post_ra>
